<compile_context>
chip_gen: v5e
topology: v5e:2x2
jax: 0.10.0
libtpu: 0.0.40
codegen_flags: <defaults>
</compile_context>

<pallas_src>
import functools

import jax
import jax.numpy as jnp
import numpy as np
from jax import lax
from jax.experimental import pallas as pl
from jax.experimental.pallas import tpu as pltpu

_LANE = 128


def _round_up(x, m):
    return ((x + m - 1) // m) * m


def _vmem_bytes(tile_m, tile_n, d_pad):
    """Conservative per-call VMEM estimate for a (tile_m, tile_n) plan."""
    lane_m = _round_up(tile_m, _LANE)
    anchor = 2 * d_pad * lane_m * 2                 # bf16 [D, TM], double-buffered
    contrast = 2 * tile_n * d_pad * 2               # bf16 [TN, D], double-buffered
    labels = 2 * 2 * 8 * lane_m * 4                 # anchor labels + 1/count (1, TM)
    labels += 2 * tile_n * _LANE * 4                # contrast labels (TN, 1), lane-padded
    out = 2 * 8 * lane_m * 4
    scratch = 3 * 8 * lane_m * 4
    temps = 5 * tile_n * lane_m * 4                 # f32 logits/exp/mask temporaries
    return anchor + contrast + labels + out + scratch + temps


def _vmem_budget():
    try:
        phys = int(pltpu.get_tpu_info().vmem_capacity_bytes)
    except Exception:
        phys = 64 << 20                             # v7x-safe fallback (64 MiB physical)
    return min(int(phys * 0.7), 96 << 20)


def _pick_tile_m(a_rows):
    if a_rows <= _LANE:
        return _round_up(a_rows, 8)                 # single (lane-undersized) tile
    cands = (128, 256, 512)
    min_pad = min(_round_up(a_rows, c) for c in cands)
    best = [c for c in cands if _round_up(a_rows, c) == min_pad]
    # At equal padding cost, prefer a tile that yields >= 2 anchor tiles so the
    # "parallel" grid axis can split across v7x's two TensorCores; among those
    # take the largest tile (fewer grid steps / fewer contrast re-reads).
    multi = [c for c in best if min_pad // c >= 2]
    return max(multi) if multi else max(best)


def _pick_tile_n(n_rows, tile_m, d_pad, budget):
    n_full = _round_up(n_rows, 8)
    if _vmem_bytes(tile_m, n_full, d_pad) <= budget:
        return n_full                               # VMEM-resident contrast slab
    for tn in (1024, 512, 256, 128):
        if tn < n_full and _vmem_bytes(tile_m, tn, d_pad) <= budget:
            return tn
    # TODO(synk): for very large d_pad add an inner D-tiling grid axis instead
    # of falling back to the minimal contrast tile.
    return 128


def _supcon_kernel(anchor_t_ref, contrast_ref, alab_ref, clab_ref, invc_ref,
                   out_ref, m_scr, l_scr, num_scr, *,
                   inv_temp, loss_scale, n_valid, tile_m, tile_n, has_pad):
    i = pl.program_id(0)                            # anchor tile   ("parallel")
    j = pl.program_id(1)                            # contrast tile (reduction)
    nj = pl.num_programs(1)

    @pl.when(j == 0)
    def _init():
        m_scr[...] = jnp.full_like(m_scr, -jnp.inf)
        l_scr[...] = jnp.zeros_like(l_scr)
        num_scr[...] = jnp.zeros_like(num_scr)

    # [TN, TM] logits^T on the MXU: bf16 inputs, f32 accumulation.  The anchor
    # slab is pre-transposed on the host, so this is a plain [TN,D] x [D,TM].
    s = lax.dot_general(contrast_ref[...], anchor_t_ref[...],
                        dimension_numbers=(((1,), (0,)), ((), ())),
                        preferred_element_type=jnp.float32)
    # Keep 1/temperature in f32 on the logits tile (VALU filler under the
    # EUP-bound exp) rather than pre-scaling the bf16 features on host.
    s = s * inv_temp                                # anchor_dot_contrast / T

    # Positive-pair mask rebuilt from two tiny label vectors (VPU compare);
    # never an [A, N] float-mask DMA.
    pos_lab = clab_ref[...] == alab_ref[...]        # (TN, TM) via broadcast

    def _accumulate(keep, valid):
        # Flash-style online logsumexp over the contrast (sublane) axis plus
        # the positive-logit accumulation.  keep/valid are None on the
        # mask-free common path.
        if valid is None:
            m_tile = jnp.max(s, axis=0, keepdims=True)
        else:
            m_tile = jnp.max(jnp.where(valid, s, -jnp.inf), axis=0,
                             keepdims=True)
        m_new = jnp.maximum(m_scr[...], m_tile)                     # (1, TM)
        p = jnp.exp(s - m_new)
        pos = pos_lab
        if keep is not None:
            p = p * keep.astype(jnp.float32)
            pos = jnp.logical_and(pos, keep)
        l_scr[...] = (jnp.exp(m_scr[...] - m_new) * l_scr[...]
                      + jnp.sum(p, axis=0, keepdims=True))
        m_scr[...] = m_new
        # sum(mask * logits); the reference's row-max shift cancels
        # algebraically, so no log_prob tile is ever materialized.
        num_scr[...] += jnp.sum(pos.astype(jnp.float32) * s,
                                axis=0, keepdims=True)

    # Masks are only needed on tiles containing the self-contrast diagonal or
    # the padded tail of the contrast axis.
    overlaps = jnp.logical_and(i * tile_m < (j + 1) * tile_n,
                               j * tile_n < (i + 1) * tile_m)
    if has_pad:
        needs_mask = jnp.logical_or(overlaps, j == nj - 1)
    else:
        needs_mask = overlaps

    @pl.when(needs_mask)
    def _masked_path():
        con_idx = j * tile_n + lax.broadcasted_iota(jnp.int32, (tile_n, 1), 0)
        anc_idx = i * tile_m + lax.broadcasted_iota(jnp.int32, (1, tile_m), 1)
        con_valid = con_idx < n_valid                                # (TN, 1)
        keep = jnp.logical_and(con_valid, con_idx != anc_idx)        # "logits_mask"
        _accumulate(keep, con_valid)

    @pl.when(jnp.logical_not(needs_mask))
    def _fast_path():
        _accumulate(None, None)

    @pl.when(j == nj - 1)
    def _finalize():
        log_z = m_scr[...] + jnp.log(l_scr[...])
        mean_log_prob_pos = num_scr[...] * invc_ref[...] - log_z
        out_ref[...] = loss_scale * mean_log_prob_pos                # (1, TM), lane-dense


def supcon_loss(features, labels=None, mask=None, *, temperature=0.07,
                contrast_mode='all', base_temperature=0.07, _tiles=None):
    """JAX/Pallas equivalent of SupConLoss.forward (labels / SimCLR paths)."""
    if features.ndim < 3:
        raise ValueError('`features` needs to be [bsz, n_views, ...], '
                         'at least 3 dimensions are required')
    if features.ndim > 3:
        features = features.reshape(features.shape[0], features.shape[1], -1)
    bsz, n_views, dim = features.shape

    if labels is not None and mask is not None:
        raise ValueError('Cannot define both `labels` and `mask`')
    if mask is not None:
        # TODO(synk): arbitrary (possibly asymmetric) [bsz, bsz] masks would need
        # an [A, N] mask DMA path; only the labels / SimCLR paths are kernelized.
        raise NotImplementedError('pass `labels` (or neither) instead of `mask`')
    if labels is None:
        labels = jnp.arange(bsz, dtype=jnp.int32)       # identity mask == SimCLR
    else:
        labels = jnp.asarray(labels).reshape(-1).astype(jnp.int32)
        if labels.shape[0] != bsz:
            raise ValueError('Num of labels does not match num of features')

    contrast_count = n_views
    # view-major stacking == torch.cat(torch.unbind(features, dim=1), dim=0)
    contrast = jnp.swapaxes(features, 0, 1).reshape(n_views * bsz, dim)
    if contrast_mode == 'one':
        anchor = features[:, 0]
        anchor_count = 1
    elif contrast_mode == 'all':
        anchor = contrast
        anchor_count = contrast_count
    else:
        raise ValueError('Unknown mode: {}'.format(contrast_mode))

    a_rows = anchor_count * bsz                         # A
    n_rows = contrast_count * bsz                       # N
    anchor_labels = jnp.tile(labels, anchor_count)      # [A] int32
    contrast_labels = jnp.tile(labels, contrast_count)  # [N] int32

    # Per-anchor positive counts (exact, host side): contrast rows sharing the
    # label, minus the anchor itself.  count == 0 -> 1/count == inf and
    # 0 * inf == NaN, matching the reference's 0/0 behaviour.
    matches = jnp.sum(labels[None, :] == labels[:, None], axis=1)     # [bsz]
    pos_counts = (contrast_count * matches - 1).astype(jnp.float32)
    inv_counts = jnp.tile(1.0 / pos_counts, anchor_count)             # [A]

    d_pad = _round_up(dim, _LANE)                       # lane-aligned feature axis
    budget = _vmem_budget()
    if _tiles is not None:
        tile_m, tile_n = _tiles                         # test / benchmarking hook
    else:
        tile_m = _pick_tile_m(a_rows)
        tile_n = _pick_tile_n(n_rows, tile_m, d_pad, budget)
    a_pad = _round_up(a_rows, tile_m)
    n_pad = _round_up(n_rows, tile_n)
    vmem_limit = min(budget, max(32 << 20,
                                 _vmem_bytes(tile_m, tile_n, d_pad) + (2 << 20)))

    # bf16 features for the MXU (f32 accumulation in-kernel); zero padding on
    # the row and feature axes is exact for the dot products.  Anchors are
    # pre-transposed to [D, A] so the kernel matmul is plain [TN,D] x [D,TM].
    anchor_t = jnp.zeros((d_pad, a_pad), jnp.bfloat16)
    anchor_t = anchor_t.at[:dim, :a_rows].set(anchor.astype(jnp.bfloat16).T)
    contrast_p = jnp.zeros((n_pad, d_pad), jnp.bfloat16)
    contrast_p = contrast_p.at[:n_rows, :dim].set(contrast.astype(jnp.bfloat16))
    alab_p = jnp.full((1, a_pad), -1, jnp.int32).at[0, :a_rows].set(anchor_labels)
    clab_p = jnp.full((n_pad, 1), -2, jnp.int32).at[:n_rows, 0].set(contrast_labels)
    invc_p = jnp.zeros((1, a_pad), jnp.float32).at[0, :a_rows].set(inv_counts)

    grid = (a_pad // tile_m, n_pad // tile_n)
    kernel = functools.partial(
        _supcon_kernel,
        inv_temp=float(1.0 / temperature),
        loss_scale=float(-(temperature / base_temperature)),
        n_valid=n_rows, tile_m=tile_m, tile_n=tile_n,
        has_pad=(n_pad > n_rows))

    per_anchor = pl.pallas_call(
        kernel,
        out_shape=jax.ShapeDtypeStruct((1, a_pad), jnp.float32),
        grid_spec=pltpu.PrefetchScalarGridSpec(
            num_scalar_prefetch=0,
            grid=grid,
            in_specs=[
                # anchors^T: block index changes only with i -> one DMA per
                # anchor tile (not per grid step).
                pl.BlockSpec((d_pad, tile_m), lambda i, j: (0, i)),
                # contrast: streamed along j; when tile_n == n_pad the block
                # index is constant so the slab is fetched once and stays
                # VMEM-resident for the whole grid.
                pl.BlockSpec((tile_n, d_pad), lambda i, j: (j, 0)),
                pl.BlockSpec((1, tile_m), lambda i, j: (0, i)),     # anchor labels
                pl.BlockSpec((tile_n, 1), lambda i, j: (j, 0)),     # contrast labels
                pl.BlockSpec((1, tile_m), lambda i, j: (0, i)),     # 1 / #positives
            ],
            out_specs=pl.BlockSpec((1, tile_m), lambda i, j: (0, i)),
            scratch_shapes=[pltpu.VMEM((1, tile_m), jnp.float32)] * 3,
        ),
        compiler_params=pltpu.CompilerParams(
            dimension_semantics=("parallel", "arbitrary"),
            vmem_limit_bytes=int(vmem_limit)),
    )(anchor_t, contrast_p, alab_p, clab_p, invc_p)

    # loss.view(anchor_count, batch_size).mean() == mean over the A real rows
    # (padded anchor lanes are sliced away before the reduction).
    return jnp.mean(per_anchor[0, :a_rows])


def _reference_supcon(features, labels, temperature=0.07, base_temperature=0.07):
    """Pure-JAX f32 reference mirroring the PyTorch code (contrast_mode='all')."""
    bsz, n_views, _ = features.shape
    lab = labels.reshape(-1, 1)
    base_mask = (lab == lab.T).astype(jnp.float32)
    contrast = jnp.swapaxes(features, 0, 1).reshape(n_views * bsz, -1)
    anchor = contrast
    logits = jnp.matmul(anchor, contrast.T,
                        precision=lax.Precision.HIGHEST) / temperature
    logits = logits - jnp.max(logits, axis=1, keepdims=True)
    a_rows = anchor.shape[0]
    mask = jnp.tile(base_mask, (n_views, n_views))
    logits_mask = 1.0 - jnp.eye(a_rows, dtype=jnp.float32)
    mask = mask * logits_mask
    exp_logits = jnp.exp(logits) * logits_mask
    log_prob = logits - jnp.log(jnp.sum(exp_logits, axis=1, keepdims=True))
    mean_log_prob_pos = jnp.sum(mask * log_prob, axis=1) / jnp.sum(mask, axis=1)
    loss = -(temperature / base_temperature) * mean_log_prob_pos
    return jnp.mean(loss)


def _check_case(key, bsz, n_views, dim, n_classes, tiles=None):
    kf, kl = jax.random.split(key)
    feats = jax.random.normal(kf, (bsz, n_views, dim), dtype=jnp.float32)
    feats = feats / jnp.linalg.norm(feats, axis=-1, keepdims=True)
    labels = jax.random.randint(kl, (bsz,), 0, n_classes)

    loss = jax.block_until_ready(supcon_loss(feats, labels=labels, _tiles=tiles))

    # Reference on the same bf16-rounded features (tight) and on f32 (loose);
    # bf16 MXU inputs with f32 accumulation are fine for a loss but not 1e-3
    # identical to an f32-HIGHEST matmul.
    feats_bf16 = feats.astype(jnp.bfloat16).astype(jnp.float32)
    ref_bf16 = jax.block_until_ready(_reference_supcon(feats_bf16, labels))
    ref_f32 = jax.block_until_ready(_reference_supcon(feats, labels))

    assert np.isfinite(float(loss)), float(loss)
    assert abs(float(loss) - float(ref_bf16)) < 2e-2, (float(loss), float(ref_bf16))
    assert abs(float(loss) - float(ref_f32)) < 6e-2, (float(loss), float(ref_f32))


if __name__ == "__main__":
    key = jax.random.PRNGKey(0)
    k1, k2, k3 = jax.random.split(key, 3)

    # Small single-tile case matching the module's intent.
    _check_case(k1, bsz=8, n_views=2, dim=32, n_classes=3)
    # Multi-anchor-tile case with the contrast slab VMEM-resident (grid (ni, 1)).
    _check_case(k2, bsz=160, n_views=2, dim=40, n_classes=4)
    # Forced small tiles: exercises the streaming-contrast path, the online
    # logsumexp across contrast tiles, contrast-axis padding, and the mask-free
    # fast path on off-diagonal tiles.
    _check_case(k3, bsz=160, n_views=2, dim=40, n_classes=4, tiles=(128, 128))

    print("KERNEL_OK")
</pallas_src>

<mosaic_0001>
module attributes {stable_mosaic.version = 11 : i64} {
  func.func @_supcon_kernel(%arg0: i32, %arg1: i32, %arg2: memref<128x16xbf16, #tpu.memory_space<vmem>>, %arg3: memref<16x128xbf16, #tpu.memory_space<vmem>>, %arg4: memref<1x16xi32, #tpu.memory_space<vmem>>, %arg5: memref<16x1xi32, #tpu.memory_space<vmem>>, %arg6: memref<1x16xf32, #tpu.memory_space<vmem>>, %arg7: memref<1x16xf32, #tpu.memory_space<vmem>>, %arg8: memref<1x16xf32, #tpu.memory_space<vmem>>, %arg9: memref<1x16xf32, #tpu.memory_space<vmem>>, %arg10: memref<1x16xf32, #tpu.memory_space<vmem>>) attributes {dimension_semantics = [#tpu.dimension_semantics<parallel>, #tpu.dimension_semantics<arbitrary>], iteration_bounds = array<i64: 1, 1>, scalar_prefetch = 0 : i64, scratch_operands = 3 : i64, tpu.core_type = #tpu.core_type<tc>, window_params = [{transform_indices = @transform_0, window_bounds = array<i64: 128, 16>}, {transform_indices = @transform_1, window_bounds = array<i64: 16, 128>}, {transform_indices = @transform_2, window_bounds = array<i64: 1, 16>}, {transform_indices = @transform_3, window_bounds = array<i64: 16, 1>}, {transform_indices = @transform_4, window_bounds = array<i64: 1, 16>}, {transform_indices = @transform_5, window_bounds = array<i64: 1, 16>}]} {
    %c0_i32 = arith.constant 0 : i32
    %0 = arith.cmpi eq, %arg1, %c0_i32 : i32
    %1 = arith.extui %0 : i1 to i32
    %c0_i32_0 = arith.constant 0 : i32
    %2 = arith.cmpi ne, %1, %c0_i32_0 : i32
    scf.if %2 {
      %cst_17 = arith.constant 0xFF800000 : f32
      %30 = vector.broadcast %cst_17 : f32 to vector<1x16xf32>
      %c0_18 = arith.constant 0 : index
      %c0_19 = arith.constant 0 : index
      %31 = vector.load %arg8[%c0_18, %c0_19] : memref<1x16xf32, #tpu.memory_space<vmem>>, vector<1x16xf32>
      tpu.vector_store %arg8[%c0_18, %c0_19], %30 {strides = array<i32>} : memref<1x16xf32, #tpu.memory_space<vmem>>, vector<1x16xf32>,
      %cst_20 = arith.constant 0.000000e+00 : f32
      %32 = vector.broadcast %cst_20 : f32 to vector<1x16xf32>
      %c0_21 = arith.constant 0 : index
      %c0_22 = arith.constant 0 : index
      %33 = vector.load %arg9[%c0_21, %c0_22] : memref<1x16xf32, #tpu.memory_space<vmem>>, vector<1x16xf32>
      tpu.vector_store %arg9[%c0_21, %c0_22], %32 {strides = array<i32>} : memref<1x16xf32, #tpu.memory_space<vmem>>, vector<1x16xf32>,
      %cst_23 = arith.constant 0.000000e+00 : f32
      %34 = vector.broadcast %cst_23 : f32 to vector<1x16xf32>
      %c0_24 = arith.constant 0 : index
      %c0_25 = arith.constant 0 : index
      %35 = vector.load %arg10[%c0_24, %c0_25] : memref<1x16xf32, #tpu.memory_space<vmem>>, vector<1x16xf32>
      tpu.vector_store %arg10[%c0_24, %c0_25], %34 {strides = array<i32>} : memref<1x16xf32, #tpu.memory_space<vmem>>, vector<1x16xf32>,
    } else {
    }
    %c0 = arith.constant 0 : index
    %c0_1 = arith.constant 0 : index
    %3 = vector.load %arg3[%c0, %c0_1] : memref<16x128xbf16, #tpu.memory_space<vmem>>, vector<16x128xbf16>
    %c0_2 = arith.constant 0 : index
    %c0_3 = arith.constant 0 : index
    %4 = vector.load %arg2[%c0_2, %c0_3] : memref<128x16xbf16, #tpu.memory_space<vmem>>, vector<128x16xbf16>
    %cst = arith.constant dense<0.000000e+00> : vector<16x16xf32>
    %5 = tpu.matmul %3, %4, %cst {dimension_numbers = #tpu.dot_dimension_numbers<[1], [0], [0], [1], [0, 0, 1, 1], [], []>} : vector<16x128xbf16>, vector<128x16xbf16>, vector<16x16xf32> -> vector<16x16xf32>
    %cst_4 = arith.constant 14.2857141 : f32
    %6 = vector.broadcast %cst_4 : f32 to vector<16x16xf32>
    %7 = arith.mulf %5, %6 : vector<16x16xf32>
    %c0_5 = arith.constant 0 : index
    %c0_6 = arith.constant 0 : index
    %8 = vector.load %arg5[%c0_5, %c0_6] : memref<16x1xi32, #tpu.memory_space<vmem>>, vector<16x1xi32>
    %c0_7 = arith.constant 0 : index
    %c0_8 = arith.constant 0 : index
    %9 = vector.load %arg4[%c0_7, %c0_8] : memref<1x16xi32, #tpu.memory_space<vmem>>, vector<1x16xi32>
    %10 = vector.broadcast %8 : vector<16x1xi32> to vector<16x16xi32>
    %11 = vector.broadcast %9 : vector<1x16xi32> to vector<16x16xi32>
    %12 = arith.cmpi eq, %10, %11 : vector<16x16xi32>
    %c16_i32 = arith.constant 16 : i32
    %13 = arith.muli %arg0, %c16_i32 : i32
    %c1_i32 = arith.constant 1 : i32
    %14 = arith.addi %arg1, %c1_i32 : i32
    %c16_i32_9 = arith.constant 16 : i32
    %15 = arith.muli %14, %c16_i32_9 : i32
    %16 = arith.cmpi slt, %13, %15 : i32
    %c16_i32_10 = arith.constant 16 : i32
    %17 = arith.muli %arg1, %c16_i32_10 : i32
    %c1_i32_11 = arith.constant 1 : i32
    %18 = arith.addi %arg0, %c1_i32_11 : i32
    %c16_i32_12 = arith.constant 16 : i32
    %19 = arith.muli %18, %c16_i32_12 : i32
    %20 = arith.cmpi slt, %17, %19 : i32
    %21 = arith.andi %16, %20 : i1
    %22 = arith.extui %21 : i1 to i32
    %c0_i32_13 = arith.constant 0 : i32
    %23 = arith.cmpi ne, %22, %c0_i32_13 : i32
    scf.if %23 {
      %c16_i32_17 = arith.constant 16 : i32
      %30 = arith.muli %arg1, %c16_i32_17 : i32
      %31 = tpu.iota {dimensions = array<i32: 0>} : vector<16x1xi32>
      %32 = vector.broadcast %30 : i32 to vector<16x1xi32>
      %33 = arith.addi %32, %31 : vector<16x1xi32>
      %c16_i32_18 = arith.constant 16 : i32
      %34 = arith.muli %arg0, %c16_i32_18 : i32
      %35 = tpu.iota {dimensions = array<i32: 1>} : vector<1x16xi32>
      %36 = vector.broadcast %34 : i32 to vector<1x16xi32>
      %37 = arith.addi %36, %35 : vector<1x16xi32>
      %c16_i32_19 = arith.constant 16 : i32
      %38 = vector.broadcast %c16_i32_19 : i32 to vector<16x1xi32>
      %39 = arith.cmpi slt, %33, %38 : vector<16x1xi32>
      %40 = vector.broadcast %33 : vector<16x1xi32> to vector<16x16xi32>
      %41 = vector.broadcast %37 : vector<1x16xi32> to vector<16x16xi32>
      %42 = arith.cmpi ne, %40, %41 : vector<16x16xi32>
      %43 = vector.broadcast %39 : vector<16x1xi1> to vector<16x16xi1>
      %44 = arith.andi %43, %42 : vector<16x16xi1>
      %cst_20 = arith.constant 0xFF800000 : f32
      %45 = vector.shape_cast %39 : vector<16x1xi1> to vector<16x1xi1>
      %46 = vector.broadcast %45 : vector<16x1xi1> to vector<16x16xi1>
      %47 = vector.broadcast %cst_20 : f32 to vector<16x16xf32>
      %48 = arith.select %46, %7, %47 : vector<16x16xi1>, vector<16x16xf32>
      %cst_21 = arith.constant dense<0xFF800000> : vector<16xf32>
      %49 = vector.multi_reduction <maximumf>, %48, %cst_21 [0] : vector<16x16xf32> to vector<16xf32>
      %50 = vector.shape_cast %49 : vector<16xf32> to vector<1x16xf32>
      %c0_22 = arith.constant 0 : index
      %c0_23 = arith.constant 0 : index
      %51 = vector.load %arg8[%c0_22, %c0_23] : memref<1x16xf32, #tpu.memory_space<vmem>>, vector<1x16xf32>
      %52 = arith.maximumf %51, %50 : vector<1x16xf32>
      %53 = vector.broadcast %52 : vector<1x16xf32> to vector<16x16xf32>
      %54 = arith.subf %7, %53 : vector<16x16xf32>
      %55 = math.exp %54 : vector<16x16xf32>
      %56 = arith.extui %44 : vector<16x16xi1> to vector<16x16xi32>
      %57 = arith.sitofp %56 : vector<16x16xi32> to vector<16x16xf32>
      %58 = arith.mulf %55, %57 : vector<16x16xf32>
      %59 = arith.andi %12, %44 : vector<16x16xi1>
      %c0_24 = arith.constant 0 : index
      %c0_25 = arith.constant 0 : index
      %60 = vector.load %arg8[%c0_24, %c0_25] : memref<1x16xf32, #tpu.memory_space<vmem>>, vector<1x16xf32>
      %61 = arith.subf %60, %52 : vector<1x16xf32>
      %62 = math.exp %61 : vector<1x16xf32>
      %c0_26 = arith.constant 0 : index
      %c0_27 = arith.constant 0 : index
      %63 = vector.load %arg9[%c0_26, %c0_27] : memref<1x16xf32, #tpu.memory_space<vmem>>, vector<1x16xf32>
      %64 = arith.mulf %62, %63 : vector<1x16xf32>
      %cst_28 = arith.constant dense<0.000000e+00> : vector<16xf32>
      %65 = vector.multi_reduction <add>, %58, %cst_28 [0] : vector<16x16xf32> to vector<16xf32>
      %66 = vector.shape_cast %65 : vector<16xf32> to vector<1x16xf32>
      %67 = arith.addf %64, %66 : vector<1x16xf32>
      %c0_29 = arith.constant 0 : index
      %c0_30 = arith.constant 0 : index
      %68 = vector.load %arg9[%c0_29, %c0_30] : memref<1x16xf32, #tpu.memory_space<vmem>>, vector<1x16xf32>
      tpu.vector_store %arg9[%c0_29, %c0_30], %67 {strides = array<i32>} : memref<1x16xf32, #tpu.memory_space<vmem>>, vector<1x16xf32>,
      %c0_31 = arith.constant 0 : index
      %c0_32 = arith.constant 0 : index
      %69 = vector.load %arg8[%c0_31, %c0_32] : memref<1x16xf32, #tpu.memory_space<vmem>>, vector<1x16xf32>
      tpu.vector_store %arg8[%c0_31, %c0_32], %52 {strides = array<i32>} : memref<1x16xf32, #tpu.memory_space<vmem>>, vector<1x16xf32>,
      %c0_33 = arith.constant 0 : index
      %c0_34 = arith.constant 0 : index
      %70 = vector.load %arg10[%c0_33, %c0_34] : memref<1x16xf32, #tpu.memory_space<vmem>>, vector<1x16xf32>
      %71 = arith.extui %59 : vector<16x16xi1> to vector<16x16xi32>
      %72 = arith.sitofp %71 : vector<16x16xi32> to vector<16x16xf32>
      %73 = arith.mulf %72, %7 : vector<16x16xf32>
      %cst_35 = arith.constant dense<0.000000e+00> : vector<16xf32>
      %74 = vector.multi_reduction <add>, %73, %cst_35 [0] : vector<16x16xf32> to vector<16xf32>
      %75 = vector.shape_cast %74 : vector<16xf32> to vector<1x16xf32>
      %76 = arith.addf %70, %75 : vector<1x16xf32>
      %c0_36 = arith.constant 0 : index
      %c0_37 = arith.constant 0 : index
      %77 = vector.load %arg10[%c0_36, %c0_37] : memref<1x16xf32, #tpu.memory_space<vmem>>, vector<1x16xf32>
      tpu.vector_store %arg10[%c0_36, %c0_37], %76 {strides = array<i32>} : memref<1x16xf32, #tpu.memory_space<vmem>>, vector<1x16xf32>,
    } else {
    }
    %true = arith.constant true
    %24 = arith.xori %21, %true : i1
    %25 = arith.extui %24 : i1 to i32
    %c0_i32_14 = arith.constant 0 : i32
    %26 = arith.cmpi ne, %25, %c0_i32_14 : i32
    scf.if %26 {
      %cst_17 = arith.constant dense<0xFF800000> : vector<16xf32>
      %30 = vector.multi_reduction <maximumf>, %7, %cst_17 [0] : vector<16x16xf32> to vector<16xf32>
      %31 = vector.shape_cast %30 : vector<16xf32> to vector<1x16xf32>
      %c0_18 = arith.constant 0 : index
      %c0_19 = arith.constant 0 : index
      %32 = vector.load %arg8[%c0_18, %c0_19] : memref<1x16xf32, #tpu.memory_space<vmem>>, vector<1x16xf32>
      %33 = arith.maximumf %32, %31 : vector<1x16xf32>
      %34 = vector.broadcast %33 : vector<1x16xf32> to vector<16x16xf32>
      %35 = arith.subf %7, %34 : vector<16x16xf32>
      %36 = math.exp %35 : vector<16x16xf32>
      %c0_20 = arith.constant 0 : index
      %c0_21 = arith.constant 0 : index
      %37 = vector.load %arg8[%c0_20, %c0_21] : memref<1x16xf32, #tpu.memory_space<vmem>>, vector<1x16xf32>
      %38 = arith.subf %37, %33 : vector<1x16xf32>
      %39 = math.exp %38 : vector<1x16xf32>
      %c0_22 = arith.constant 0 : index
      %c0_23 = arith.constant 0 : index
      %40 = vector.load %arg9[%c0_22, %c0_23] : memref<1x16xf32, #tpu.memory_space<vmem>>, vector<1x16xf32>
      %41 = arith.mulf %39, %40 : vector<1x16xf32>
      %cst_24 = arith.constant dense<0.000000e+00> : vector<16xf32>
      %42 = vector.multi_reduction <add>, %36, %cst_24 [0] : vector<16x16xf32> to vector<16xf32>
      %43 = vector.shape_cast %42 : vector<16xf32> to vector<1x16xf32>
      %44 = arith.addf %41, %43 : vector<1x16xf32>
      %c0_25 = arith.constant 0 : index
      %c0_26 = arith.constant 0 : index
      %45 = vector.load %arg9[%c0_25, %c0_26] : memref<1x16xf32, #tpu.memory_space<vmem>>, vector<1x16xf32>
      tpu.vector_store %arg9[%c0_25, %c0_26], %44 {strides = array<i32>} : memref<1x16xf32, #tpu.memory_space<vmem>>, vector<1x16xf32>,
      %c0_27 = arith.constant 0 : index
      %c0_28 = arith.constant 0 : index
      %46 = vector.load %arg8[%c0_27, %c0_28] : memref<1x16xf32, #tpu.memory_space<vmem>>, vector<1x16xf32>
      tpu.vector_store %arg8[%c0_27, %c0_28], %33 {strides = array<i32>} : memref<1x16xf32, #tpu.memory_space<vmem>>, vector<1x16xf32>,
      %c0_29 = arith.constant 0 : index
      %c0_30 = arith.constant 0 : index
      %47 = vector.load %arg10[%c0_29, %c0_30] : memref<1x16xf32, #tpu.memory_space<vmem>>, vector<1x16xf32>
      %48 = arith.extui %12 : vector<16x16xi1> to vector<16x16xi32>
      %49 = arith.sitofp %48 : vector<16x16xi32> to vector<16x16xf32>
      %50 = arith.mulf %49, %7 : vector<16x16xf32>
      %cst_31 = arith.constant dense<0.000000e+00> : vector<16xf32>
      %51 = vector.multi_reduction <add>, %50, %cst_31 [0] : vector<16x16xf32> to vector<16xf32>
      %52 = vector.shape_cast %51 : vector<16xf32> to vector<1x16xf32>
      %53 = arith.addf %47, %52 : vector<1x16xf32>
      %c0_32 = arith.constant 0 : index
      %c0_33 = arith.constant 0 : index
      %54 = vector.load %arg10[%c0_32, %c0_33] : memref<1x16xf32, #tpu.memory_space<vmem>>, vector<1x16xf32>
      tpu.vector_store %arg10[%c0_32, %c0_33], %53 {strides = array<i32>} : memref<1x16xf32, #tpu.memory_space<vmem>>, vector<1x16xf32>,
    } else {
    }
    %c0_i32_15 = arith.constant 0 : i32
    %27 = arith.cmpi eq, %arg1, %c0_i32_15 : i32
    %28 = arith.extui %27 : i1 to i32
    %c0_i32_16 = arith.constant 0 : i32
    %29 = arith.cmpi ne, %28, %c0_i32_16 : i32
    scf.if %29 {
      %c0_17 = arith.constant 0 : index
      %c0_18 = arith.constant 0 : index
      %30 = vector.load %arg8[%c0_17, %c0_18] : memref<1x16xf32, #tpu.memory_space<vmem>>, vector<1x16xf32>
      %c0_19 = arith.constant 0 : index
      %c0_20 = arith.constant 0 : index
      %31 = vector.load %arg9[%c0_19, %c0_20] : memref<1x16xf32, #tpu.memory_space<vmem>>, vector<1x16xf32>
      %32 = math.log %31 : vector<1x16xf32>
      %33 = arith.addf %30, %32 : vector<1x16xf32>
      %c0_21 = arith.constant 0 : index
      %c0_22 = arith.constant 0 : index
      %34 = vector.load %arg10[%c0_21, %c0_22] : memref<1x16xf32, #tpu.memory_space<vmem>>, vector<1x16xf32>
      %c0_23 = arith.constant 0 : index
      %c0_24 = arith.constant 0 : index
      %35 = vector.load %arg6[%c0_23, %c0_24] : memref<1x16xf32, #tpu.memory_space<vmem>>, vector<1x16xf32>
      %36 = arith.mulf %34, %35 : vector<1x16xf32>
      %37 = arith.subf %36, %33 : vector<1x16xf32>
      %cst_25 = arith.constant -1.000000e+00 : f32
      %38 = vector.broadcast %cst_25 : f32 to vector<1x16xf32>
      %39 = arith.mulf %38, %37 : vector<1x16xf32>
      %c0_26 = arith.constant 0 : index
      %c0_27 = arith.constant 0 : index
      %40 = vector.load %arg7[%c0_26, %c0_27] : memref<1x16xf32, #tpu.memory_space<vmem>>, vector<1x16xf32>
      tpu.vector_store %arg7[%c0_26, %c0_27], %39 {strides = array<i32>} : memref<1x16xf32, #tpu.memory_space<vmem>>, vector<1x16xf32>,
    } else {
    }
    return
  }
  func.func @transform_0(%arg0: i32, %arg1: i32) -> (i32, i32) {
    %c0_i32 = arith.constant 0 : i32
    %c0_i32_0 = arith.constant 0 : i32
    return %c0_i32, %arg0 : i32, i32
  }
  func.func @transform_1(%arg0: i32, %arg1: i32) -> (i32, i32) {
    %c0_i32 = arith.constant 0 : i32
    %c0_i32_0 = arith.constant 0 : i32
    return %arg1, %c0_i32 : i32, i32
  }
  func.func @transform_2(%arg0: i32, %arg1: i32) -> (i32, i32) {
    %c0_i32 = arith.constant 0 : i32
    %c0_i32_0 = arith.constant 0 : i32
    return %c0_i32, %arg0 : i32, i32
  }
  func.func @transform_3(%arg0: i32, %arg1: i32) -> (i32, i32) {
    %c0_i32 = arith.constant 0 : i32
    %c0_i32_0 = arith.constant 0 : i32
    return %arg1, %c0_i32 : i32, i32
  }
  func.func @transform_4(%arg0: i32, %arg1: i32) -> (i32, i32) {
    %c0_i32 = arith.constant 0 : i32
    %c0_i32_0 = arith.constant 0 : i32
    return %c0_i32, %arg0 : i32, i32
  }
  func.func @transform_5(%arg0: i32, %arg1: i32) -> (i32, i32) {
    %c0_i32 = arith.constant 0 : i32
    %c0_i32_0 = arith.constant 0 : i32
    return %c0_i32, %arg0 : i32, i32
  }
}

</mosaic_0001>

<bundles_post_ra>
// kernel: tpu_custom_call.1
= control target key start
LH: loop header
LB: loop body
LE: loop exit
PB: predicated region body
PF: predicated region fallthrough
CT: control target
= control target key end

     0   :  { %v410_v2 = vmov 0   ;;  %s503_s0 = inlined_call_operand.vmem [shape: bf16[128,16], index: 0, kind: input, shape index: {}]   ;;  %s504_s1 = inlined_call_operand.vmem [shape: bf16[16,128], index: 1, kind: input, shape index: {}]   ;;  %s505_s2 = inlined_call_operand.vmem [shape: s32[1,16], index: 2, kind: input, shape index: {}]   ;;  %s506_s3 = inlined_call_operand.vmem [shape: s32[16,1], index: 3, kind: input, shape index: {}]   ;;  %s507_s4 = inlined_call_operand.vmem [shape: f32[1,16], index: 4, kind: input, shape index: {}]   ;;  %s508_s5 = inlined_call_operand.hbm [shape: f32[1,16], index: 5, kind: output, shape index: {}]  }
   0x1   :  { %v369_v0 = vld [vmem:[%s503_s0 + $0x38] sm:$0xff]  ;;  %v368_v1 = vld [vmem:[%s503_s0 + $0x30] sm:$0xff]  ;;  %374 = vset.pattern.permute.xlu0 %v410_v2  ;;  %v117_v3 = vld [vmem:[%s506_s3] sm:$0xff] }
   0x2   :  { %101 = vmatpush.bf16.msra.mxu0 %v369_v0  ;;  %121 = vperm.xlu0 %374, %v117_v3  }
   0x3   :  { %10 = vsyncpa [#allocation6], 0  ;;  %v367_v4 = vld [vmem:[%s503_s0 + $0x28] sm:$0xff]  ;;  %v366_v6 = vld [vmem:[%s503_s0 + $0x20] sm:$0xff]  ;;  %vm25_vm0 = vcmask 122880   ;;  %v411_v12 = vmov -inf   ;;  %v141_v15 = vlaneseq }
   0x4   :  { %v118_v5 = vld [vmem:[%s506_s3 + $0x8] sm:$0xff]  ;;  %v365_v7 = vld [vmem:[%s503_s0 + $0x18] sm:$0xff]  ;;  %v364_v8 = vld [vmem:[%s503_s0 + $0x10] sm:$0xff]  ;;  %26 = vst.msk [vmem:[#allocation2] sm:$0x1] %vm25_vm0, %v411_v12  ;;  %v412_v13 = vmov 0.0  }
   0x5   :  { %v363_v9 = vld [vmem:[%s503_s0 + $0x8] sm:$0xff]  ;;  %v362_v10 = vld [vmem:[%s503_s0] sm:$0xff]  ;;  %28 = vst.msk [vmem:[#allocation4] sm:$0x1] %vm25_vm0, %v412_v13  ;;  %v142_v17 = vshrl.u32 %v141_v15, 7  ;;  %v148_v18 = vand.u32 127, %v141_v15 }
   0x6   :  { %102 = vmatpush.bf16.msra.mxu0 %v368_v1  ;;  %v361_v11 = vld [vmem:[%s504_s1] sm:$0xff]  ;;  %27 = vst.msk [vmem:[#allocation3] sm:$0x1] %vm25_vm0, %v412_v13  ;;  %vm163_vm7 = vcmask 130048   ;;  %s310_s19 = sshll.u32 %s508_s5, 4  ;;  %s311_s19 = int_to_ptr.hbm [resolvable:$true] %s310_s19 }
   0x7   :  { %v375_v16 = vld [vmem:[%s505_s2] ss:$0 sm:$0xff]  ;;  %v143_v19 = vadd.s32 8, %v142_v17  ;;  %vm153_vm1 = vcmp.ne.s32.totalorder %v142_v17, %v148_v18  ;;  %s413_s2 = smov [#allocation5]  }
   0x8   :  { %v355_v56 = vsel %vm153_vm1, 1.0, %v412_v13  ;;  %s308_s16 = sshll.u32 %s413_s2, 4  ;;  %s309_s16 = int_to_ptr.vmem [resolvable:$true] %s308_s16 }
   0x9   :  { %vm154_vm3 = vcmp.ne.s32.totalorder %v143_v19, %v148_v18 }
   0xa   :  { %103 = vmatpush.bf16.msra.mxu0 %v367_v4  ;;  %124 = vperm.xlu0 %374, %v118_v5   ;;  %v356_v57 = vsel %vm154_vm3, 1.0, %v412_v13 }
   0xb   :  { %v173_v44 = vld [vmem:[#allocation2] sm:$0x1] }
   0xc   :  { %v210_v47 = vld [vmem:[#allocation4] sm:$0x1] }
   0xe   :  { %104 = vmatpush.bf16.msra.mxu0 %v366_v6 }
  0x12   :  { %105 = vmatpush.bf16.msra.mxu0 %v365_v7 }
  0x16   :  { %106 = vmatpush.bf16.msra.mxu0 %v364_v8  ;;  %v195_v8 = vld [vmem:[#allocation3] sm:$0x1] }
  0x1a   :  { %107 = vmatpush.bf16.msra.mxu0 %v363_v9 }
  0x1e   :  { %108 = vmatpush.bf16.msra.mxu0 %v362_v10 }
  0x21   :  { %109 = vmatmul.bf16.vlgmr.msra.gmra.mxu0 %v361_v11 }
  0x74   :  { %v122_v14 = vpop.permute.xlu0 %121 }
  0x75   :  { %vm127_vm2 = vcmp.eq.s32.totalorder %v122_v14, %v375_v16 }
  0x76   :  { %vm190_vm5 = vmand %vm127_vm2, %vm153_vm1 }
  0x77   :  { %v357_v23 = vsel %vm190_vm5, 1.0, %v412_v13 }
  0x7c   :  { %v125_v20 = vpop.permute.xlu0 %124 }
  0x7d   :  { %vm128_vm4 = vcmp.eq.s32.totalorder %v125_v20, %v375_v16  ;;  %v297_v16 = vld [vmem:[%s507_s4] sm:$0x1] }
  0x7e   :  { %vm191_vm6 = vmand %vm128_vm4, %vm154_vm3 }
  0x7f   :  { %v358_v24 = vsel %vm191_vm6, 1.0, %v412_v13 }
  0x9e   :  { %v110_v21 = vpop.f32.mrf.mxu0 }
  0x9f   :  { %v115_v22 = vmul.f32 14.285714, %v110_v21 }
  0xa1   :  { %v215_v26 = vmul.f32 %v357_v23, %v115_v22  ;;  %v164_v28 = vsel %vm163_vm7, %v115_v22, -inf }
  0xa3   :  { %v217_v32 = vsel %vm163_vm7, %v215_v26, 0.0 }
  0xa6   :  { %v112_v25 = vpop.f32.mrf.mxu0 }
  0xa7   :  { %v116_v27 = vmul.f32 14.285714, %v112_v25 }
  0xa9   :  { %v165_v29 = vsel %vm163_vm7, %v116_v27, -inf  ;;  %v216_v30 = vmul.f32 %v358_v24, %v116_v27 }
  0xaa   :  { %v166_v31 = vmax.f32 %v164_v28, %v165_v29 }
  0xab   :  { %v218_v33 = vsel %vm163_vm7, %v216_v30, 0.0 }
  0xac   :  { %v167_v34 = vrot.slane %v166_v31, 4  ;;  %v219_v35 = vadd.f32 %v218_v33, %v217_v32 }
  0xae   :  { %v168_v36 = vmax.f32 %v166_v31, %v167_v34  ;;  %v220_v37 = vrot.slane %v219_v35, 4 }
  0xb0   :  { %v169_v38 = vrot.slane %v168_v36, 2  ;;  %v221_v39 = vadd.f32 %v220_v37, %v219_v35 }
  0xb2   :  { %v170_v40 = vmax.f32 %v168_v36, %v169_v38  ;;  %v222_v41 = vrot.slane %v221_v39, 2 }
  0xb4   :  { %v171_v42 = vrot.slane %v170_v40, 1  ;;  %v223_v43 = vadd.f32 %v222_v41, %v221_v39 }
  0xb6   :  { %v172_v45 = vmax.f32 %v170_v40, %v171_v42  ;;  %v224_v46 = vrot.slane %v223_v43, 1 }
  0xb8   :  { %v174_v48 = vmax.f32 %v173_v44, %v172_v45  ;;  %v225_v49 = vadd.f32 %v224_v46, %v223_v43 }
  0xba   :  { %v176_v50 = vperm.slane %v174_v48, 0  ;;  %209 = vst.msk [vmem:[#allocation2] sm:$0x1] %vm25_vm0, %v174_v48  ;;  %v226_v51 = vadd.f32 %v225_v49, %v210_v47  ;;  %v192_v59 = vsub.f32 %v173_v44, %v174_v48 }
  0xbc   :  { %v178_v52 = vsub.f32 %v115_v22, %v176_v50  ;;  %v179_v53 = vsub.f32 %v116_v27, %v176_v50  ;;  %227 = vst.msk [vmem:[#allocation4] sm:$0x1] %vm25_vm0, %v226_v51  ;;  %v193_v0 = vmul.f32 1.442695, %v192_v59 }
  0xbe   :  { %v180_v54 = vmul.f32 1.442695, %v178_v52  ;;  %v182_v55 = vmul.f32 1.442695, %v179_v53 }
  0xc0   :  { %376 = vpow2.f32 %v180_v54 }
  0xc1   :  { %378 = vpow2.f32 %v182_v55  ;;  %v291_v18 = vld [vmem:[#allocation2] sm:$0x1] }
  0xc2   :  { %380 = vpow2.f32 %v193_v0 }
  0xc3   :  { %v296_v15 = vld [vmem:[#allocation4] sm:$0x1] }
  0xc4   :  { %v298_v20 = vmul.f32 %v297_v16, %v296_v15 }
  0xc6   :  { %v377_v58 = vpop.eup %376 }
  0xc7   :  { %v379_v60 = vpop.eup %378  ;;  %v188_v61 = vmul.f32 %v377_v58, %v355_v56 }
  0xc8   :  { %v189_v62 = vmul.f32 %v379_v60, %v356_v57  ;;  %v381_v7 = vpop.eup %380 }
  0xc9   :  { %v197_v63 = vsel %vm163_vm7, %v188_v61, 0.0  ;;  %v196_v11 = vmul.f32 %v381_v7, %v195_v8 }
  0xca   :  { %v198_v1 = vsel %vm163_vm7, %v189_v62, 0.0 }
  0xcb   :  { %v199_v2 = vadd.f32 %v198_v1, %v197_v63 }
  0xcd   :  { %v200_v3 = vrot.slane %v199_v2, 4 }
  0xcf   :  { %v201_v4 = vadd.f32 %v200_v3, %v199_v2 }
  0xd1   :  { %v202_v5 = vrot.slane %v201_v4, 2 }
  0xd3   :  { %v203_v6 = vadd.f32 %v202_v5, %v201_v4 }
  0xd5   :  { %v204_v9 = vrot.slane %v203_v6, 1 }
  0xd7   :  { %v205_v10 = vadd.f32 %v204_v9, %v203_v6 }
  0xd9   :  { %v206_v12 = vadd.f32 %v205_v10, %v196_v11 }
  0xdb   :  { %208 = vst.msk [vmem:[#allocation3] sm:$0x1] %vm25_vm0, %v206_v12 }
  0xe2   :  { %v292_v13 = vld [vmem:[#allocation3] sm:$0x1] }
  0xe3   :  { %382 = vlog2.f32 %v292_v13 }
  0xe9   :  { %v383_v14 = vpop.eup %382 }
  0xea   :  { %v294_v17 = vmul.f32 0.6931472, %v383_v14 }
  0xec   :  { %v295_v19 = vadd.f32 %v294_v17, %v291_v18 }
  0xee   :  { %v299_v21 = vsub.f32 %v298_v20, %v295_v19 }
  0xf0   :  { %v300_v22 = vmul.f32 -1.0, %v299_v21 }
  0xf2   :  { %302 = vst.msk [vmem:[#allocation5] sm:$0x1] %vm25_vm0, %v300_v22 }
  0xf3   :  { %313 = dma.vmem_to_hbm [thread:$0]  %s309_s16, 16, %s311_s19, [#allocation6]  }
  0xf4   :  { %408 = dma.done.wait [#allocation6], 16  }
  0xf5   :  { %409 = vsyncadd [#allocation6], 4294967280 }
  0xf6   :  { %318 = vsyncpa [#allocation6], 1 }

</bundles_post_ra>
